<compile_context>
chip_gen: v7x
topology: tpu7x:2x2x1
jax: 0.10.0
libtpu: 0.0.40
codegen_flags: <defaults>
</compile_context>

<pallas_src>
import jax
import jax.numpy as jnp
from jax.experimental import pallas as pl
from jax.experimental.pallas import tpu as pltpu

NEG_SLOPE = 0.01  # PyTorch LeakyReLU / F.leaky_relu default


def leaky_relu(x):
    return jnp.where(x > 0, x, NEG_SLOPE * x)


def _make_kernel(C, Ch, H, W, N_TILE, offs):
    HW = H * W
    OFF_W1, OFF_B1, OFF_W3, OFF_B3, OFF_W2, OFF_B2 = offs

    def kernel(x_ref, p_ref, o_ref):
        # x_ref / o_ref : (C, N_TILE, HW) -- batch on sublanes, spatial on lanes.
        def p(i):  # scalar parameter read from SMEM -> sreg
            return p_ref[i]

        # ---- boundary masks over the flattened spatial axis (built once) ----
        flat = jax.lax.broadcasted_iota(jnp.int32, (N_TILE, HW), 1)
        colw = flat % W
        first_row = flat < W
        last_row = flat >= (HW - W)
        first_col = colw == 0
        last_col = colw == (W - 1)

        # ---- Conv2d(C, Ch, 1) + LeakyReLU : VPU scalar*vector MACs ----------
        h1 = []
        for d in range(Ch):
            acc = p(OFF_W1 + d) * x_ref[0].astype(jnp.float32)
            for c in range(1, C):
                acc = acc + p(OFF_W1 + c * Ch + d) * x_ref[c].astype(jnp.float32)
            h1.append(leaky_relu(acc + p(OFF_B1 + d)))            # (N_TILE, HW)

        # ---- ReplicationPad2d(1) neighborhood, in-register (XLU rolls) ------
        # roll uses the XLU slot (separate from the VPU FMAs); clamped-edge
        # behaviour is restored with jnp.where fixups.
        taps = []  # taps[c][ky][kx] : (N_TILE, HW)
        for c in range(Ch):
            v = h1[c]
            r_up = jnp.where(first_row, v, pltpu.roll(v, W, axis=1))       # row r-1
            r_dn = jnp.where(last_row, v, pltpu.roll(v, HW - W, axis=1))   # row r+1
            taps_c = []
            for r in (r_up, v, r_dn):
                lt = jnp.where(first_col, r, pltpu.roll(r, 1, axis=1))     # col w-1
                rt = jnp.where(last_col, r, pltpu.roll(r, HW - 1, axis=1)) # col w+1
                taps_c.append((lt, r, rt))
            taps.append(taps_c)

        # ---- Conv2d(Ch, Ch, 3) + LeakyReLU : 9*Ch*Ch scalar MACs ------------
        h3 = []
        for d in range(Ch):
            acc = None
            for ky in range(3):
                for kx in range(3):
                    for c in range(Ch):
                        widx = OFF_W3 + ((ky * 3 + kx) * Ch + c) * Ch + d
                        term = p(widx) * taps[c][ky][kx]
                        acc = term if acc is None else acc + term
            h3.append(leaky_relu(acc + p(OFF_B3 + d)))

        # ---- Conv2d(Ch, C, 1) + residual + LeakyReLU, direct channel stores -
        for d in range(C):
            acc = p(OFF_W2 + d) * h3[0]
            for c in range(1, Ch):
                acc = acc + p(OFF_W2 + c * C + d) * h3[c]
            o_ref[d] = leaky_relu(
                x_ref[d].astype(jnp.float32) + acc + p(OFF_B2 + d)
            ).astype(o_ref.dtype)

    return kernel


@jax.jit
def attention_res_block(x_nchw, w1, b1, w3, b3, w2, b2):
    """Fused AttentionResBlock forward.

    x_nchw : (N, C, H, W) float32
    w1     : (C, Ch)        first 1x1 conv  (transpose of torch (Ch, C, 1, 1))
    b1     : (Ch,)
    w3     : (3, 3, Ch, Ch) 3x3 conv        (transpose of torch (Ch, Ch, 3, 3))
    b3     : (Ch,)
    w2     : (Ch, C)        second 1x1 conv
    b2     : (C,)
    returns (N, C, H, W)
    """
    N, C, H, W = x_nchw.shape
    Ch = C // 2
    HW = H * W
    N_TILE = min(N, 8)                 # batch rows packed onto sublanes
    NB = -(-N // N_TILE)               # ceil(N / N_TILE) grid steps (1 at N=2)
    Npad = NB * N_TILE

    # ---- flatten all weights/biases into one SMEM parameter vector ---------
    OFF_W1 = 0
    OFF_B1 = OFF_W1 + C * Ch
    OFF_W3 = OFF_B1 + Ch
    OFF_B3 = OFF_W3 + 9 * Ch * Ch
    OFF_W2 = OFF_B3 + Ch
    OFF_B2 = OFF_W2 + Ch * C
    params = jnp.concatenate([
        w1.reshape(-1), b1.reshape(-1), w3.reshape(-1),
        b3.reshape(-1), w2.reshape(-1), b2.reshape(-1),
    ]).astype(jnp.float32)

    # Channel-major (C, Npad, HW): each per-channel slab is (N_TILE, 256),
    # i.e. dense sublanes x dense lanes.
    x_flat = x_nchw.reshape(N, C, HW)
    if Npad != N:
        x_flat = jnp.concatenate(
            [x_flat, jnp.zeros((Npad - N, C, HW), x_flat.dtype)], axis=0)
    x_cnhw = jnp.transpose(x_flat, (1, 0, 2))

    kernel = _make_kernel(C, Ch, H, W, N_TILE,
                          (OFF_W1, OFF_B1, OFF_W3, OFF_B3, OFF_W2, OFF_B2))

    flops = 2 * N * HW * (C * Ch + 9 * Ch * Ch + Ch * C)
    bytes_accessed = 2 * Npad * C * HW * 4 + int(params.size) * 4

    out = pl.pallas_call(
        kernel,
        out_shape=jax.ShapeDtypeStruct((C, Npad, HW), x_cnhw.dtype),
        grid=(NB,),
        in_specs=[
            pl.BlockSpec((C, N_TILE, HW), lambda n: (0, n, 0)),      # activations
            pl.BlockSpec(memory_space=pltpu.MemorySpace.SMEM),        # params
        ],
        out_specs=pl.BlockSpec((C, N_TILE, HW), lambda n: (0, n, 0)),
        input_output_aliases={0: 0},
        cost_estimate=pl.CostEstimate(
            flops=flops, transcendentals=0, bytes_accessed=bytes_accessed),
        compiler_params=pltpu.CompilerParams(
            dimension_semantics=("parallel",)),   # shards only when NB >= 2
    )(x_cnhw, params)

    out = jnp.transpose(out, (1, 0, 2))[:N]
    return out.reshape(N, C, H, W)


def ref_forward(x_nchw, w1, b1, w3, b3, w2, b2):
    """Pure-JAX reference with identical semantics (NCHW in/out)."""
    x = jnp.transpose(x_nchw, (0, 2, 3, 1))  # NHWC
    N, H, W, C = x.shape
    Ch = w1.shape[1]
    h1 = leaky_relu(jnp.einsum('nhwc,cd->nhwd', x, w1) + b1)
    hp = jnp.pad(h1, ((0, 0), (1, 1), (1, 1), (0, 0)), mode='edge')
    acc = jnp.zeros((N, H, W, Ch), jnp.float32) + b3
    for ky in range(3):
        for kx in range(3):
            acc = acc + jnp.einsum('nhwc,cd->nhwd',
                                   hp[:, ky:ky + H, kx:kx + W, :], w3[ky, kx])
    h3 = leaky_relu(acc)
    h4 = jnp.einsum('nhwc,cd->nhwd', h3, w2) + b2
    out = leaky_relu(x + h4)
    return jnp.transpose(out, (0, 3, 1, 2))


if __name__ == "__main__":
    N, C, H, W = 2, 4, 16, 16          # nb_ft = 4
    Ch = C // 2
    key = jax.random.PRNGKey(0)
    ks = jax.random.split(key, 7)
    scale = 0.1

    x_nchw = jax.random.normal(ks[0], (N, C, H, W), jnp.float32)
    w1 = scale * jax.random.normal(ks[1], (C, Ch), jnp.float32)
    b1 = scale * jax.random.normal(ks[2], (Ch,), jnp.float32)
    w3 = scale * jax.random.normal(ks[3], (3, 3, Ch, Ch), jnp.float32)
    b3 = scale * jax.random.normal(ks[4], (Ch,), jnp.float32)
    w2 = scale * jax.random.normal(ks[5], (Ch, C), jnp.float32)
    b2 = scale * jax.random.normal(ks[6], (C,), jnp.float32)

    out = attention_res_block(x_nchw, w1, b1, w3, b3, w2, b2)
    jax.block_until_ready(out)

    ref = ref_forward(x_nchw, w1, b1, w3, b3, w2, b2)
    assert out.shape == (N, C, H, W)
    assert jnp.allclose(out, ref, atol=1e-3, rtol=1e-3), "mismatch vs reference"
    print("KERNEL_OK")
</pallas_src>

<mosaic_0001>
module attributes {stable_mosaic.version = 11 : i64} {
  func.func @kernel(%arg0: i32, %arg1: memref<4x2x256xf32, #tpu.memory_space<vmem>>, %arg2: memref<60xf32, #tpu.memory_space<smem>>, %arg3: memref<4x2x256xf32, #tpu.memory_space<vmem>>) attributes {dimension_semantics = [#tpu.dimension_semantics<parallel>], iteration_bounds = array<i64: 1>, scalar_prefetch = 0 : i64, scratch_operands = 0 : i64, tpu.core_type = #tpu.core_type<tc>, window_params = [{transform_indices = @transform_0, window_bounds = array<i64: 4, 2, 256>}, {transform_indices = @transform_1, window_bounds = array<i64: 60>}, {transform_indices = @transform_2, window_bounds = array<i64: 4, 2, 256>}]} {
    %0 = tpu.iota {dimensions = array<i32: 1>} : vector<2x256xi32>
    %c16_i32 = arith.constant 16 : i32
    %c0_i32 = arith.constant 0 : i32
    %1 = arith.cmpi eq, %c16_i32, %c0_i32 : i32
    %c1_i32 = arith.constant 1 : i32
    %2 = arith.select %1, %c1_i32, %c16_i32 : i32
    %3 = vector.broadcast %2 : i32 to vector<2x256xi32>
    %4 = arith.remsi %0, %3 : vector<2x256xi32>
    %c0_i32_0 = arith.constant 0 : i32
    %5 = vector.broadcast %c0_i32_0 : i32 to vector<2x256xi32>
    %6 = arith.cmpi ne, %4, %5 : vector<2x256xi32>
    %c0_i32_1 = arith.constant 0 : i32
    %7 = vector.broadcast %c0_i32_1 : i32 to vector<2x256xi32>
    %8 = arith.cmpi slt, %4, %7 : vector<2x256xi32>
    %c0_i32_2 = arith.constant 0 : i32
    %9 = arith.cmpi slt, %2, %c0_i32_2 : i32
    %10 = vector.broadcast %9 : i1 to vector<2x256xi1>
    %11 = vector.broadcast %10 : vector<2x256xi1> to vector<2x256xi1>
    %12 = arith.xori %8, %11 : vector<2x256xi1>
    %13 = arith.andi %12, %6 : vector<2x256xi1>
    %14 = vector.broadcast %2 : i32 to vector<2x256xi32>
    %15 = arith.addi %4, %14 : vector<2x256xi32>
    %16 = arith.select %13, %15, %4 : vector<2x256xi1>, vector<2x256xi32>
    %c16_i32_3 = arith.constant 16 : i32
    %17 = vector.broadcast %c16_i32_3 : i32 to vector<2x256xi32>
    %18 = arith.cmpi slt, %0, %17 : vector<2x256xi32>
    %c240_i32 = arith.constant 240 : i32
    %19 = vector.broadcast %c240_i32 : i32 to vector<2x256xi32>
    %20 = arith.cmpi sge, %0, %19 : vector<2x256xi32>
    %c0_i32_4 = arith.constant 0 : i32
    %21 = vector.broadcast %c0_i32_4 : i32 to vector<2x256xi32>
    %22 = arith.cmpi eq, %16, %21 : vector<2x256xi32>
    %c15_i32 = arith.constant 15 : i32
    %23 = vector.broadcast %c15_i32 : i32 to vector<2x256xi32>
    %24 = arith.cmpi eq, %16, %23 : vector<2x256xi32>
    %c0 = arith.constant 0 : index
    %25 = memref.load %arg2[%c0] : memref<60xf32, #tpu.memory_space<smem>>
    %c0_5 = arith.constant 0 : index
    %c0_6 = arith.constant 0 : index
    %c0_7 = arith.constant 0 : index
    %26 = vector.load %arg1[%c0_5, %c0_6, %c0_7] : memref<4x2x256xf32, #tpu.memory_space<vmem>>, vector<1x2x256xf32>
    %27 = vector.shape_cast %26 : vector<1x2x256xf32> to vector<2x256xf32>
    %28 = vector.broadcast %25 : f32 to vector<2x256xf32>
    %29 = arith.mulf %28, %27 : vector<2x256xf32>
    %c2 = arith.constant 2 : index
    %30 = memref.load %arg2[%c2] : memref<60xf32, #tpu.memory_space<smem>>
    %c1 = arith.constant 1 : index
    %c0_8 = arith.constant 0 : index
    %c0_9 = arith.constant 0 : index
    %31 = vector.load %arg1[%c1, %c0_8, %c0_9] : memref<4x2x256xf32, #tpu.memory_space<vmem>>, vector<1x2x256xf32>
    %32 = vector.shape_cast %31 : vector<1x2x256xf32> to vector<2x256xf32>
    %33 = vector.broadcast %30 : f32 to vector<2x256xf32>
    %34 = arith.mulf %33, %32 : vector<2x256xf32>
    %35 = arith.addf %29, %34 : vector<2x256xf32>
    %c4 = arith.constant 4 : index
    %36 = memref.load %arg2[%c4] : memref<60xf32, #tpu.memory_space<smem>>
    %c2_10 = arith.constant 2 : index
    %c0_11 = arith.constant 0 : index
    %c0_12 = arith.constant 0 : index
    %37 = vector.load %arg1[%c2_10, %c0_11, %c0_12] : memref<4x2x256xf32, #tpu.memory_space<vmem>>, vector<1x2x256xf32>
    %38 = vector.shape_cast %37 : vector<1x2x256xf32> to vector<2x256xf32>
    %39 = vector.broadcast %36 : f32 to vector<2x256xf32>
    %40 = arith.mulf %39, %38 : vector<2x256xf32>
    %41 = arith.addf %35, %40 : vector<2x256xf32>
    %c6 = arith.constant 6 : index
    %42 = memref.load %arg2[%c6] : memref<60xf32, #tpu.memory_space<smem>>
    %c3 = arith.constant 3 : index
    %c0_13 = arith.constant 0 : index
    %c0_14 = arith.constant 0 : index
    %43 = vector.load %arg1[%c3, %c0_13, %c0_14] : memref<4x2x256xf32, #tpu.memory_space<vmem>>, vector<1x2x256xf32>
    %44 = vector.shape_cast %43 : vector<1x2x256xf32> to vector<2x256xf32>
    %45 = vector.broadcast %42 : f32 to vector<2x256xf32>
    %46 = arith.mulf %45, %44 : vector<2x256xf32>
    %47 = arith.addf %41, %46 : vector<2x256xf32>
    %c8 = arith.constant 8 : index
    %48 = memref.load %arg2[%c8] : memref<60xf32, #tpu.memory_space<smem>>
    %49 = vector.broadcast %48 : f32 to vector<2x256xf32>
    %50 = arith.addf %47, %49 : vector<2x256xf32>
    %cst = arith.constant 0.000000e+00 : f32
    %51 = vector.broadcast %cst : f32 to vector<2x256xf32>
    %52 = arith.cmpf ogt, %50, %51 : vector<2x256xf32>
    %cst_15 = arith.constant 0.00999999977 : f32
    %53 = vector.broadcast %cst_15 : f32 to vector<2x256xf32>
    %54 = arith.mulf %53, %50 : vector<2x256xf32>
    %55 = arith.select %52, %50, %54 : vector<2x256xi1>, vector<2x256xf32>
    %c1_16 = arith.constant 1 : index
    %56 = memref.load %arg2[%c1_16] : memref<60xf32, #tpu.memory_space<smem>>
    %c0_17 = arith.constant 0 : index
    %c0_18 = arith.constant 0 : index
    %c0_19 = arith.constant 0 : index
    %57 = vector.load %arg1[%c0_17, %c0_18, %c0_19] : memref<4x2x256xf32, #tpu.memory_space<vmem>>, vector<1x2x256xf32>
    %58 = vector.shape_cast %57 : vector<1x2x256xf32> to vector<2x256xf32>
    %59 = vector.broadcast %56 : f32 to vector<2x256xf32>
    %60 = arith.mulf %59, %58 : vector<2x256xf32>
    %c3_20 = arith.constant 3 : index
    %61 = memref.load %arg2[%c3_20] : memref<60xf32, #tpu.memory_space<smem>>
    %c1_21 = arith.constant 1 : index
    %c0_22 = arith.constant 0 : index
    %c0_23 = arith.constant 0 : index
    %62 = vector.load %arg1[%c1_21, %c0_22, %c0_23] : memref<4x2x256xf32, #tpu.memory_space<vmem>>, vector<1x2x256xf32>
    %63 = vector.shape_cast %62 : vector<1x2x256xf32> to vector<2x256xf32>
    %64 = vector.broadcast %61 : f32 to vector<2x256xf32>
    %65 = arith.mulf %64, %63 : vector<2x256xf32>
    %66 = arith.addf %60, %65 : vector<2x256xf32>
    %c5 = arith.constant 5 : index
    %67 = memref.load %arg2[%c5] : memref<60xf32, #tpu.memory_space<smem>>
    %c2_24 = arith.constant 2 : index
    %c0_25 = arith.constant 0 : index
    %c0_26 = arith.constant 0 : index
    %68 = vector.load %arg1[%c2_24, %c0_25, %c0_26] : memref<4x2x256xf32, #tpu.memory_space<vmem>>, vector<1x2x256xf32>
    %69 = vector.shape_cast %68 : vector<1x2x256xf32> to vector<2x256xf32>
    %70 = vector.broadcast %67 : f32 to vector<2x256xf32>
    %71 = arith.mulf %70, %69 : vector<2x256xf32>
    %72 = arith.addf %66, %71 : vector<2x256xf32>
    %c7 = arith.constant 7 : index
    %73 = memref.load %arg2[%c7] : memref<60xf32, #tpu.memory_space<smem>>
    %c3_27 = arith.constant 3 : index
    %c0_28 = arith.constant 0 : index
    %c0_29 = arith.constant 0 : index
    %74 = vector.load %arg1[%c3_27, %c0_28, %c0_29] : memref<4x2x256xf32, #tpu.memory_space<vmem>>, vector<1x2x256xf32>
    %75 = vector.shape_cast %74 : vector<1x2x256xf32> to vector<2x256xf32>
    %76 = vector.broadcast %73 : f32 to vector<2x256xf32>
    %77 = arith.mulf %76, %75 : vector<2x256xf32>
    %78 = arith.addf %72, %77 : vector<2x256xf32>
    %c9 = arith.constant 9 : index
    %79 = memref.load %arg2[%c9] : memref<60xf32, #tpu.memory_space<smem>>
    %80 = vector.broadcast %79 : f32 to vector<2x256xf32>
    %81 = arith.addf %78, %80 : vector<2x256xf32>
    %cst_30 = arith.constant 0.000000e+00 : f32
    %82 = vector.broadcast %cst_30 : f32 to vector<2x256xf32>
    %83 = arith.cmpf ogt, %81, %82 : vector<2x256xf32>
    %cst_31 = arith.constant 0.00999999977 : f32
    %84 = vector.broadcast %cst_31 : f32 to vector<2x256xf32>
    %85 = arith.mulf %84, %81 : vector<2x256xf32>
    %86 = arith.select %83, %81, %85 : vector<2x256xi1>, vector<2x256xf32>
    %c16_i32_32 = arith.constant 16 : i32
    %87 = tpu.dynamic_rotate %55 by %c16_i32_32 dim 1 : vector<2x256xf32>, i32 -> vector<2x256xf32>
    %88 = arith.select %18, %55, %87 : vector<2x256xi1>, vector<2x256xf32>
    %c240_i32_33 = arith.constant 240 : i32
    %89 = tpu.dynamic_rotate %55 by %c240_i32_33 dim 1 : vector<2x256xf32>, i32 -> vector<2x256xf32>
    %90 = arith.select %20, %55, %89 : vector<2x256xi1>, vector<2x256xf32>
    %c1_i32_34 = arith.constant 1 : i32
    %91 = tpu.dynamic_rotate %88 by %c1_i32_34 dim 1 : vector<2x256xf32>, i32 -> vector<2x256xf32>
    %92 = arith.select %22, %88, %91 : vector<2x256xi1>, vector<2x256xf32>
    %c255_i32 = arith.constant 255 : i32
    %93 = tpu.dynamic_rotate %88 by %c255_i32 dim 1 : vector<2x256xf32>, i32 -> vector<2x256xf32>
    %94 = arith.select %24, %88, %93 : vector<2x256xi1>, vector<2x256xf32>
    %c1_i32_35 = arith.constant 1 : i32
    %95 = tpu.dynamic_rotate %55 by %c1_i32_35 dim 1 : vector<2x256xf32>, i32 -> vector<2x256xf32>
    %96 = arith.select %22, %55, %95 : vector<2x256xi1>, vector<2x256xf32>
    %c255_i32_36 = arith.constant 255 : i32
    %97 = tpu.dynamic_rotate %55 by %c255_i32_36 dim 1 : vector<2x256xf32>, i32 -> vector<2x256xf32>
    %98 = arith.select %24, %55, %97 : vector<2x256xi1>, vector<2x256xf32>
    %c1_i32_37 = arith.constant 1 : i32
    %99 = tpu.dynamic_rotate %90 by %c1_i32_37 dim 1 : vector<2x256xf32>, i32 -> vector<2x256xf32>
    %100 = arith.select %22, %90, %99 : vector<2x256xi1>, vector<2x256xf32>
    %c255_i32_38 = arith.constant 255 : i32
    %101 = tpu.dynamic_rotate %90 by %c255_i32_38 dim 1 : vector<2x256xf32>, i32 -> vector<2x256xf32>
    %102 = arith.select %24, %90, %101 : vector<2x256xi1>, vector<2x256xf32>
    %c16_i32_39 = arith.constant 16 : i32
    %103 = tpu.dynamic_rotate %86 by %c16_i32_39 dim 1 : vector<2x256xf32>, i32 -> vector<2x256xf32>
    %104 = arith.select %18, %86, %103 : vector<2x256xi1>, vector<2x256xf32>
    %c240_i32_40 = arith.constant 240 : i32
    %105 = tpu.dynamic_rotate %86 by %c240_i32_40 dim 1 : vector<2x256xf32>, i32 -> vector<2x256xf32>
    %106 = arith.select %20, %86, %105 : vector<2x256xi1>, vector<2x256xf32>
    %c1_i32_41 = arith.constant 1 : i32
    %107 = tpu.dynamic_rotate %104 by %c1_i32_41 dim 1 : vector<2x256xf32>, i32 -> vector<2x256xf32>
    %108 = arith.select %22, %104, %107 : vector<2x256xi1>, vector<2x256xf32>
    %c255_i32_42 = arith.constant 255 : i32
    %109 = tpu.dynamic_rotate %104 by %c255_i32_42 dim 1 : vector<2x256xf32>, i32 -> vector<2x256xf32>
    %110 = arith.select %24, %104, %109 : vector<2x256xi1>, vector<2x256xf32>
    %c1_i32_43 = arith.constant 1 : i32
    %111 = tpu.dynamic_rotate %86 by %c1_i32_43 dim 1 : vector<2x256xf32>, i32 -> vector<2x256xf32>
    %112 = arith.select %22, %86, %111 : vector<2x256xi1>, vector<2x256xf32>
    %c255_i32_44 = arith.constant 255 : i32
    %113 = tpu.dynamic_rotate %86 by %c255_i32_44 dim 1 : vector<2x256xf32>, i32 -> vector<2x256xf32>
    %114 = arith.select %24, %86, %113 : vector<2x256xi1>, vector<2x256xf32>
    %c1_i32_45 = arith.constant 1 : i32
    %115 = tpu.dynamic_rotate %106 by %c1_i32_45 dim 1 : vector<2x256xf32>, i32 -> vector<2x256xf32>
    %116 = arith.select %22, %106, %115 : vector<2x256xi1>, vector<2x256xf32>
    %c255_i32_46 = arith.constant 255 : i32
    %117 = tpu.dynamic_rotate %106 by %c255_i32_46 dim 1 : vector<2x256xf32>, i32 -> vector<2x256xf32>
    %118 = arith.select %24, %106, %117 : vector<2x256xi1>, vector<2x256xf32>
    %c10 = arith.constant 10 : index
    %119 = memref.load %arg2[%c10] : memref<60xf32, #tpu.memory_space<smem>>
    %120 = vector.broadcast %119 : f32 to vector<2x256xf32>
    %121 = arith.mulf %120, %92 : vector<2x256xf32>
    %c12 = arith.constant 12 : index
    %122 = memref.load %arg2[%c12] : memref<60xf32, #tpu.memory_space<smem>>
    %123 = vector.broadcast %122 : f32 to vector<2x256xf32>
    %124 = arith.mulf %123, %108 : vector<2x256xf32>
    %125 = arith.addf %121, %124 : vector<2x256xf32>
    %c14 = arith.constant 14 : index
    %126 = memref.load %arg2[%c14] : memref<60xf32, #tpu.memory_space<smem>>
    %127 = vector.broadcast %126 : f32 to vector<2x256xf32>
    %128 = arith.mulf %127, %88 : vector<2x256xf32>
    %129 = arith.addf %125, %128 : vector<2x256xf32>
    %c16 = arith.constant 16 : index
    %130 = memref.load %arg2[%c16] : memref<60xf32, #tpu.memory_space<smem>>
    %131 = vector.broadcast %130 : f32 to vector<2x256xf32>
    %132 = arith.mulf %131, %104 : vector<2x256xf32>
    %133 = arith.addf %129, %132 : vector<2x256xf32>
    %c18 = arith.constant 18 : index
    %134 = memref.load %arg2[%c18] : memref<60xf32, #tpu.memory_space<smem>>
    %135 = vector.broadcast %134 : f32 to vector<2x256xf32>
    %136 = arith.mulf %135, %94 : vector<2x256xf32>
    %137 = arith.addf %133, %136 : vector<2x256xf32>
    %c20 = arith.constant 20 : index
    %138 = memref.load %arg2[%c20] : memref<60xf32, #tpu.memory_space<smem>>
    %139 = vector.broadcast %138 : f32 to vector<2x256xf32>
    %140 = arith.mulf %139, %110 : vector<2x256xf32>
    %141 = arith.addf %137, %140 : vector<2x256xf32>
    %c22 = arith.constant 22 : index
    %142 = memref.load %arg2[%c22] : memref<60xf32, #tpu.memory_space<smem>>
    %143 = vector.broadcast %142 : f32 to vector<2x256xf32>
    %144 = arith.mulf %143, %96 : vector<2x256xf32>
    %145 = arith.addf %141, %144 : vector<2x256xf32>
    %c24 = arith.constant 24 : index
    %146 = memref.load %arg2[%c24] : memref<60xf32, #tpu.memory_space<smem>>
    %147 = vector.broadcast %146 : f32 to vector<2x256xf32>
    %148 = arith.mulf %147, %112 : vector<2x256xf32>
    %149 = arith.addf %145, %148 : vector<2x256xf32>
    %c26 = arith.constant 26 : index
    %150 = memref.load %arg2[%c26] : memref<60xf32, #tpu.memory_space<smem>>
    %151 = vector.broadcast %150 : f32 to vector<2x256xf32>
    %152 = arith.mulf %151, %55 : vector<2x256xf32>
    %153 = arith.addf %149, %152 : vector<2x256xf32>
    %c28 = arith.constant 28 : index
    %154 = memref.load %arg2[%c28] : memref<60xf32, #tpu.memory_space<smem>>
    %155 = vector.broadcast %154 : f32 to vector<2x256xf32>
    %156 = arith.mulf %155, %86 : vector<2x256xf32>
    %157 = arith.addf %153, %156 : vector<2x256xf32>
    %c30 = arith.constant 30 : index
    %158 = memref.load %arg2[%c30] : memref<60xf32, #tpu.memory_space<smem>>
    %159 = vector.broadcast %158 : f32 to vector<2x256xf32>
    %160 = arith.mulf %159, %98 : vector<2x256xf32>
    %161 = arith.addf %157, %160 : vector<2x256xf32>
    %c32 = arith.constant 32 : index
    %162 = memref.load %arg2[%c32] : memref<60xf32, #tpu.memory_space<smem>>
    %163 = vector.broadcast %162 : f32 to vector<2x256xf32>
    %164 = arith.mulf %163, %114 : vector<2x256xf32>
    %165 = arith.addf %161, %164 : vector<2x256xf32>
    %c34 = arith.constant 34 : index
    %166 = memref.load %arg2[%c34] : memref<60xf32, #tpu.memory_space<smem>>
    %167 = vector.broadcast %166 : f32 to vector<2x256xf32>
    %168 = arith.mulf %167, %100 : vector<2x256xf32>
    %169 = arith.addf %165, %168 : vector<2x256xf32>
    %c36 = arith.constant 36 : index
    %170 = memref.load %arg2[%c36] : memref<60xf32, #tpu.memory_space<smem>>
    %171 = vector.broadcast %170 : f32 to vector<2x256xf32>
    %172 = arith.mulf %171, %116 : vector<2x256xf32>
    %173 = arith.addf %169, %172 : vector<2x256xf32>
    %c38 = arith.constant 38 : index
    %174 = memref.load %arg2[%c38] : memref<60xf32, #tpu.memory_space<smem>>
    %175 = vector.broadcast %174 : f32 to vector<2x256xf32>
    %176 = arith.mulf %175, %90 : vector<2x256xf32>
    %177 = arith.addf %173, %176 : vector<2x256xf32>
    %c40 = arith.constant 40 : index
    %178 = memref.load %arg2[%c40] : memref<60xf32, #tpu.memory_space<smem>>
    %179 = vector.broadcast %178 : f32 to vector<2x256xf32>
    %180 = arith.mulf %179, %106 : vector<2x256xf32>
    %181 = arith.addf %177, %180 : vector<2x256xf32>
    %c42 = arith.constant 42 : index
    %182 = memref.load %arg2[%c42] : memref<60xf32, #tpu.memory_space<smem>>
    %183 = vector.broadcast %182 : f32 to vector<2x256xf32>
    %184 = arith.mulf %183, %102 : vector<2x256xf32>
    %185 = arith.addf %181, %184 : vector<2x256xf32>
    %c44 = arith.constant 44 : index
    %186 = memref.load %arg2[%c44] : memref<60xf32, #tpu.memory_space<smem>>
    %187 = vector.broadcast %186 : f32 to vector<2x256xf32>
    %188 = arith.mulf %187, %118 : vector<2x256xf32>
    %189 = arith.addf %185, %188 : vector<2x256xf32>
    %c46 = arith.constant 46 : index
    %190 = memref.load %arg2[%c46] : memref<60xf32, #tpu.memory_space<smem>>
    %191 = vector.broadcast %190 : f32 to vector<2x256xf32>
    %192 = arith.addf %189, %191 : vector<2x256xf32>
    %cst_47 = arith.constant 0.000000e+00 : f32
    %193 = vector.broadcast %cst_47 : f32 to vector<2x256xf32>
    %194 = arith.cmpf ogt, %192, %193 : vector<2x256xf32>
    %cst_48 = arith.constant 0.00999999977 : f32
    %195 = vector.broadcast %cst_48 : f32 to vector<2x256xf32>
    %196 = arith.mulf %195, %192 : vector<2x256xf32>
    %197 = arith.select %194, %192, %196 : vector<2x256xi1>, vector<2x256xf32>
    %c11 = arith.constant 11 : index
    %198 = memref.load %arg2[%c11] : memref<60xf32, #tpu.memory_space<smem>>
    %199 = vector.broadcast %198 : f32 to vector<2x256xf32>
    %200 = arith.mulf %199, %92 : vector<2x256xf32>
    %c13 = arith.constant 13 : index
    %201 = memref.load %arg2[%c13] : memref<60xf32, #tpu.memory_space<smem>>
    %202 = vector.broadcast %201 : f32 to vector<2x256xf32>
    %203 = arith.mulf %202, %108 : vector<2x256xf32>
    %204 = arith.addf %200, %203 : vector<2x256xf32>
    %c15 = arith.constant 15 : index
    %205 = memref.load %arg2[%c15] : memref<60xf32, #tpu.memory_space<smem>>
    %206 = vector.broadcast %205 : f32 to vector<2x256xf32>
    %207 = arith.mulf %206, %88 : vector<2x256xf32>
    %208 = arith.addf %204, %207 : vector<2x256xf32>
    %c17 = arith.constant 17 : index
    %209 = memref.load %arg2[%c17] : memref<60xf32, #tpu.memory_space<smem>>
    %210 = vector.broadcast %209 : f32 to vector<2x256xf32>
    %211 = arith.mulf %210, %104 : vector<2x256xf32>
    %212 = arith.addf %208, %211 : vector<2x256xf32>
    %c19 = arith.constant 19 : index
    %213 = memref.load %arg2[%c19] : memref<60xf32, #tpu.memory_space<smem>>
    %214 = vector.broadcast %213 : f32 to vector<2x256xf32>
    %215 = arith.mulf %214, %94 : vector<2x256xf32>
    %216 = arith.addf %212, %215 : vector<2x256xf32>
    %c21 = arith.constant 21 : index
    %217 = memref.load %arg2[%c21] : memref<60xf32, #tpu.memory_space<smem>>
    %218 = vector.broadcast %217 : f32 to vector<2x256xf32>
    %219 = arith.mulf %218, %110 : vector<2x256xf32>
    %220 = arith.addf %216, %219 : vector<2x256xf32>
    %c23 = arith.constant 23 : index
    %221 = memref.load %arg2[%c23] : memref<60xf32, #tpu.memory_space<smem>>
    %222 = vector.broadcast %221 : f32 to vector<2x256xf32>
    %223 = arith.mulf %222, %96 : vector<2x256xf32>
    %224 = arith.addf %220, %223 : vector<2x256xf32>
    %c25 = arith.constant 25 : index
    %225 = memref.load %arg2[%c25] : memref<60xf32, #tpu.memory_space<smem>>
    %226 = vector.broadcast %225 : f32 to vector<2x256xf32>
    %227 = arith.mulf %226, %112 : vector<2x256xf32>
    %228 = arith.addf %224, %227 : vector<2x256xf32>
    %c27 = arith.constant 27 : index
    %229 = memref.load %arg2[%c27] : memref<60xf32, #tpu.memory_space<smem>>
    %230 = vector.broadcast %229 : f32 to vector<2x256xf32>
    %231 = arith.mulf %230, %55 : vector<2x256xf32>
    %232 = arith.addf %228, %231 : vector<2x256xf32>
    %c29 = arith.constant 29 : index
    %233 = memref.load %arg2[%c29] : memref<60xf32, #tpu.memory_space<smem>>
    %234 = vector.broadcast %233 : f32 to vector<2x256xf32>
    %235 = arith.mulf %234, %86 : vector<2x256xf32>
    %236 = arith.addf %232, %235 : vector<2x256xf32>
    %c31 = arith.constant 31 : index
    %237 = memref.load %arg2[%c31] : memref<60xf32, #tpu.memory_space<smem>>
    %238 = vector.broadcast %237 : f32 to vector<2x256xf32>
    %239 = arith.mulf %238, %98 : vector<2x256xf32>
    %240 = arith.addf %236, %239 : vector<2x256xf32>
    %c33 = arith.constant 33 : index
    %241 = memref.load %arg2[%c33] : memref<60xf32, #tpu.memory_space<smem>>
    %242 = vector.broadcast %241 : f32 to vector<2x256xf32>
    %243 = arith.mulf %242, %114 : vector<2x256xf32>
    %244 = arith.addf %240, %243 : vector<2x256xf32>
    %c35 = arith.constant 35 : index
    %245 = memref.load %arg2[%c35] : memref<60xf32, #tpu.memory_space<smem>>
    %246 = vector.broadcast %245 : f32 to vector<2x256xf32>
    %247 = arith.mulf %246, %100 : vector<2x256xf32>
    %248 = arith.addf %244, %247 : vector<2x256xf32>
    %c37 = arith.constant 37 : index
    %249 = memref.load %arg2[%c37] : memref<60xf32, #tpu.memory_space<smem>>
    %250 = vector.broadcast %249 : f32 to vector<2x256xf32>
    %251 = arith.mulf %250, %116 : vector<2x256xf32>
    %252 = arith.addf %248, %251 : vector<2x256xf32>
    %c39 = arith.constant 39 : index
    %253 = memref.load %arg2[%c39] : memref<60xf32, #tpu.memory_space<smem>>
    %254 = vector.broadcast %253 : f32 to vector<2x256xf32>
    %255 = arith.mulf %254, %90 : vector<2x256xf32>
    %256 = arith.addf %252, %255 : vector<2x256xf32>
    %c41 = arith.constant 41 : index
    %257 = memref.load %arg2[%c41] : memref<60xf32, #tpu.memory_space<smem>>
    %258 = vector.broadcast %257 : f32 to vector<2x256xf32>
    %259 = arith.mulf %258, %106 : vector<2x256xf32>
    %260 = arith.addf %256, %259 : vector<2x256xf32>
    %c43 = arith.constant 43 : index
    %261 = memref.load %arg2[%c43] : memref<60xf32, #tpu.memory_space<smem>>
    %262 = vector.broadcast %261 : f32 to vector<2x256xf32>
    %263 = arith.mulf %262, %102 : vector<2x256xf32>
    %264 = arith.addf %260, %263 : vector<2x256xf32>
    %c45 = arith.constant 45 : index
    %265 = memref.load %arg2[%c45] : memref<60xf32, #tpu.memory_space<smem>>
    %266 = vector.broadcast %265 : f32 to vector<2x256xf32>
    %267 = arith.mulf %266, %118 : vector<2x256xf32>
    %268 = arith.addf %264, %267 : vector<2x256xf32>
    %c47 = arith.constant 47 : index
    %269 = memref.load %arg2[%c47] : memref<60xf32, #tpu.memory_space<smem>>
    %270 = vector.broadcast %269 : f32 to vector<2x256xf32>
    %271 = arith.addf %268, %270 : vector<2x256xf32>
    %cst_49 = arith.constant 0.000000e+00 : f32
    %272 = vector.broadcast %cst_49 : f32 to vector<2x256xf32>
    %273 = arith.cmpf ogt, %271, %272 : vector<2x256xf32>
    %cst_50 = arith.constant 0.00999999977 : f32
    %274 = vector.broadcast %cst_50 : f32 to vector<2x256xf32>
    %275 = arith.mulf %274, %271 : vector<2x256xf32>
    %276 = arith.select %273, %271, %275 : vector<2x256xi1>, vector<2x256xf32>
    %c48 = arith.constant 48 : index
    %277 = memref.load %arg2[%c48] : memref<60xf32, #tpu.memory_space<smem>>
    %278 = vector.broadcast %277 : f32 to vector<2x256xf32>
    %279 = arith.mulf %278, %197 : vector<2x256xf32>
    %c52 = arith.constant 52 : index
    %280 = memref.load %arg2[%c52] : memref<60xf32, #tpu.memory_space<smem>>
    %281 = vector.broadcast %280 : f32 to vector<2x256xf32>
    %282 = arith.mulf %281, %276 : vector<2x256xf32>
    %283 = arith.addf %279, %282 : vector<2x256xf32>
    %c0_51 = arith.constant 0 : index
    %c0_52 = arith.constant 0 : index
    %c0_53 = arith.constant 0 : index
    %284 = vector.load %arg1[%c0_51, %c0_52, %c0_53] : memref<4x2x256xf32, #tpu.memory_space<vmem>>, vector<1x2x256xf32>
    %285 = vector.shape_cast %284 : vector<1x2x256xf32> to vector<2x256xf32>
    %286 = arith.addf %285, %283 : vector<2x256xf32>
    %c56 = arith.constant 56 : index
    %287 = memref.load %arg2[%c56] : memref<60xf32, #tpu.memory_space<smem>>
    %288 = vector.broadcast %287 : f32 to vector<2x256xf32>
    %289 = arith.addf %286, %288 : vector<2x256xf32>
    %cst_54 = arith.constant 0.000000e+00 : f32
    %290 = vector.broadcast %cst_54 : f32 to vector<2x256xf32>
    %291 = arith.cmpf ogt, %289, %290 : vector<2x256xf32>
    %cst_55 = arith.constant 0.00999999977 : f32
    %292 = vector.broadcast %cst_55 : f32 to vector<2x256xf32>
    %293 = arith.mulf %292, %289 : vector<2x256xf32>
    %294 = arith.select %291, %289, %293 : vector<2x256xi1>, vector<2x256xf32>
    %c0_56 = arith.constant 0 : index
    %c0_57 = arith.constant 0 : index
    %c0_58 = arith.constant 0 : index
    %295 = vector.load %arg3[%c0_56, %c0_57, %c0_58] : memref<4x2x256xf32, #tpu.memory_space<vmem>>, vector<1x2x256xf32>
    %296 = vector.shape_cast %295 : vector<1x2x256xf32> to vector<2x256xf32>
    %297 = vector.shape_cast %294 : vector<2x256xf32> to vector<1x2x256xf32>
    tpu.vector_store %arg3[%c0_56, %c0_57, %c0_58], %297 {strides = array<i32>} : memref<4x2x256xf32, #tpu.memory_space<vmem>>, vector<1x2x256xf32>,
    %c49 = arith.constant 49 : index
    %298 = memref.load %arg2[%c49] : memref<60xf32, #tpu.memory_space<smem>>
    %299 = vector.broadcast %298 : f32 to vector<2x256xf32>
    %300 = arith.mulf %299, %197 : vector<2x256xf32>
    %c53 = arith.constant 53 : index
    %301 = memref.load %arg2[%c53] : memref<60xf32, #tpu.memory_space<smem>>
    %302 = vector.broadcast %301 : f32 to vector<2x256xf32>
    %303 = arith.mulf %302, %276 : vector<2x256xf32>
    %304 = arith.addf %300, %303 : vector<2x256xf32>
    %c1_59 = arith.constant 1 : index
    %c0_60 = arith.constant 0 : index
    %c0_61 = arith.constant 0 : index
    %305 = vector.load %arg1[%c1_59, %c0_60, %c0_61] : memref<4x2x256xf32, #tpu.memory_space<vmem>>, vector<1x2x256xf32>
    %306 = vector.shape_cast %305 : vector<1x2x256xf32> to vector<2x256xf32>
    %307 = arith.addf %306, %304 : vector<2x256xf32>
    %c57 = arith.constant 57 : index
    %308 = memref.load %arg2[%c57] : memref<60xf32, #tpu.memory_space<smem>>
    %309 = vector.broadcast %308 : f32 to vector<2x256xf32>
    %310 = arith.addf %307, %309 : vector<2x256xf32>
    %cst_62 = arith.constant 0.000000e+00 : f32
    %311 = vector.broadcast %cst_62 : f32 to vector<2x256xf32>
    %312 = arith.cmpf ogt, %310, %311 : vector<2x256xf32>
    %cst_63 = arith.constant 0.00999999977 : f32
    %313 = vector.broadcast %cst_63 : f32 to vector<2x256xf32>
    %314 = arith.mulf %313, %310 : vector<2x256xf32>
    %315 = arith.select %312, %310, %314 : vector<2x256xi1>, vector<2x256xf32>
    %c1_64 = arith.constant 1 : index
    %c0_65 = arith.constant 0 : index
    %c0_66 = arith.constant 0 : index
    %316 = vector.load %arg3[%c1_64, %c0_65, %c0_66] : memref<4x2x256xf32, #tpu.memory_space<vmem>>, vector<1x2x256xf32>
    %317 = vector.shape_cast %316 : vector<1x2x256xf32> to vector<2x256xf32>
    %318 = vector.shape_cast %315 : vector<2x256xf32> to vector<1x2x256xf32>
    tpu.vector_store %arg3[%c1_64, %c0_65, %c0_66], %318 {strides = array<i32>} : memref<4x2x256xf32, #tpu.memory_space<vmem>>, vector<1x2x256xf32>,
    %c50 = arith.constant 50 : index
    %319 = memref.load %arg2[%c50] : memref<60xf32, #tpu.memory_space<smem>>
    %320 = vector.broadcast %319 : f32 to vector<2x256xf32>
    %321 = arith.mulf %320, %197 : vector<2x256xf32>
    %c54 = arith.constant 54 : index
    %322 = memref.load %arg2[%c54] : memref<60xf32, #tpu.memory_space<smem>>
    %323 = vector.broadcast %322 : f32 to vector<2x256xf32>
    %324 = arith.mulf %323, %276 : vector<2x256xf32>
    %325 = arith.addf %321, %324 : vector<2x256xf32>
    %c2_67 = arith.constant 2 : index
    %c0_68 = arith.constant 0 : index
    %c0_69 = arith.constant 0 : index
    %326 = vector.load %arg1[%c2_67, %c0_68, %c0_69] : memref<4x2x256xf32, #tpu.memory_space<vmem>>, vector<1x2x256xf32>
    %327 = vector.shape_cast %326 : vector<1x2x256xf32> to vector<2x256xf32>
    %328 = arith.addf %327, %325 : vector<2x256xf32>
    %c58 = arith.constant 58 : index
    %329 = memref.load %arg2[%c58] : memref<60xf32, #tpu.memory_space<smem>>
    %330 = vector.broadcast %329 : f32 to vector<2x256xf32>
    %331 = arith.addf %328, %330 : vector<2x256xf32>
    %cst_70 = arith.constant 0.000000e+00 : f32
    %332 = vector.broadcast %cst_70 : f32 to vector<2x256xf32>
    %333 = arith.cmpf ogt, %331, %332 : vector<2x256xf32>
    %cst_71 = arith.constant 0.00999999977 : f32
    %334 = vector.broadcast %cst_71 : f32 to vector<2x256xf32>
    %335 = arith.mulf %334, %331 : vector<2x256xf32>
    %336 = arith.select %333, %331, %335 : vector<2x256xi1>, vector<2x256xf32>
    %c2_72 = arith.constant 2 : index
    %c0_73 = arith.constant 0 : index
    %c0_74 = arith.constant 0 : index
    %337 = vector.load %arg3[%c2_72, %c0_73, %c0_74] : memref<4x2x256xf32, #tpu.memory_space<vmem>>, vector<1x2x256xf32>
    %338 = vector.shape_cast %337 : vector<1x2x256xf32> to vector<2x256xf32>
    %339 = vector.shape_cast %336 : vector<2x256xf32> to vector<1x2x256xf32>
    tpu.vector_store %arg3[%c2_72, %c0_73, %c0_74], %339 {strides = array<i32>} : memref<4x2x256xf32, #tpu.memory_space<vmem>>, vector<1x2x256xf32>,
    %c51 = arith.constant 51 : index
    %340 = memref.load %arg2[%c51] : memref<60xf32, #tpu.memory_space<smem>>
    %341 = vector.broadcast %340 : f32 to vector<2x256xf32>
    %342 = arith.mulf %341, %197 : vector<2x256xf32>
    %c55 = arith.constant 55 : index
    %343 = memref.load %arg2[%c55] : memref<60xf32, #tpu.memory_space<smem>>
    %344 = vector.broadcast %343 : f32 to vector<2x256xf32>
    %345 = arith.mulf %344, %276 : vector<2x256xf32>
    %346 = arith.addf %342, %345 : vector<2x256xf32>
    %c3_75 = arith.constant 3 : index
    %c0_76 = arith.constant 0 : index
    %c0_77 = arith.constant 0 : index
    %347 = vector.load %arg1[%c3_75, %c0_76, %c0_77] : memref<4x2x256xf32, #tpu.memory_space<vmem>>, vector<1x2x256xf32>
    %348 = vector.shape_cast %347 : vector<1x2x256xf32> to vector<2x256xf32>
    %349 = arith.addf %348, %346 : vector<2x256xf32>
    %c59 = arith.constant 59 : index
    %350 = memref.load %arg2[%c59] : memref<60xf32, #tpu.memory_space<smem>>
    %351 = vector.broadcast %350 : f32 to vector<2x256xf32>
    %352 = arith.addf %349, %351 : vector<2x256xf32>
    %cst_78 = arith.constant 0.000000e+00 : f32
    %353 = vector.broadcast %cst_78 : f32 to vector<2x256xf32>
    %354 = arith.cmpf ogt, %352, %353 : vector<2x256xf32>
    %cst_79 = arith.constant 0.00999999977 : f32
    %355 = vector.broadcast %cst_79 : f32 to vector<2x256xf32>
    %356 = arith.mulf %355, %352 : vector<2x256xf32>
    %357 = arith.select %354, %352, %356 : vector<2x256xi1>, vector<2x256xf32>
    %c3_80 = arith.constant 3 : index
    %c0_81 = arith.constant 0 : index
    %c0_82 = arith.constant 0 : index
    %358 = vector.load %arg3[%c3_80, %c0_81, %c0_82] : memref<4x2x256xf32, #tpu.memory_space<vmem>>, vector<1x2x256xf32>
    %359 = vector.shape_cast %358 : vector<1x2x256xf32> to vector<2x256xf32>
    %360 = vector.shape_cast %357 : vector<2x256xf32> to vector<1x2x256xf32>
    tpu.vector_store %arg3[%c3_80, %c0_81, %c0_82], %360 {strides = array<i32>} : memref<4x2x256xf32, #tpu.memory_space<vmem>>, vector<1x2x256xf32>,
    return
  }
  func.func @transform_0(%arg0: i32) -> (i32, i32, i32) {
    %c0_i32 = arith.constant 0 : i32
    %c0_i32_0 = arith.constant 0 : i32
    %c0_i32_1 = arith.constant 0 : i32
    return %c0_i32, %arg0, %c0_i32_0 : i32, i32, i32
  }
  func.func @transform_1(%arg0: i32) -> i32 {
    %c0_i32 = arith.constant 0 : i32
    %c0_i32_0 = arith.constant 0 : i32
    return %c0_i32 : i32
  }
  func.func @transform_2(%arg0: i32) -> (i32, i32, i32) {
    %c0_i32 = arith.constant 0 : i32
    %c0_i32_0 = arith.constant 0 : i32
    %c0_i32_1 = arith.constant 0 : i32
    return %c0_i32, %arg0, %c0_i32_0 : i32, i32, i32
  }
}

</mosaic_0001>

<bundles_post_ra>
// kernel: attention_res_block.1
= control target key start
LH: loop header
LB: loop body
LE: loop exit
PB: predicated region body
PF: predicated region fallthrough
CT: control target
= control target key end

     0   :  { %7 = vsyncpa [#allocation3], 0  ;;  %s1405_s0 = inlined_call_operand.vmem [shape: f32[4,2,256], index: 0, kind: input, shape index: {}, may-alias: {0,2}]   ;;  %s1406_s1 = inlined_call_operand.vmem [shape: f32[60], index: 1, kind: input, shape index: {}]   ;;  %s1407_s2 = inlined_call_operand.vmem [shape: f32[4,2,256], index: 2, kind: output, shape index: {}, may-alias: {0,2}]  }
   0x1   :  { %s16_s11 = sshll.u32 %s1406_s1, 4  ;;  %s17_s11 = int_to_ptr.vmem [resolvable:$true] %s16_s11 }
   0x2   :  { %s734_s12 = scalar_lea.vmem %s17_s11, 16  ;;  %p739_p1 = scmp.lt.s32.totalorder %s17_s11, %s17_s11 }
   0x3   :  { %p735_p0 = scmp.ne.s32.totalorder %s17_s11, %s734_s12  ;;  %p740_p2 = scmp.lt.s32.totalorder %s734_s12, %s734_s12 }
   0x5   :  { %p741_p3 = por %p740_p2, %p739_p1 }
   0x7   :  { %p742_p4 = pnand %p741_p3, %p735_p0 }
   0x9   :  { %745 = shalt.err (!%p742_p4)
}
   0xa   :  { %s748_s13 = smov [#allocation2]  }
   0xb   :  { %19 = dma.vmem_to_smem %s17_s11, 16, %s748_s13, [#allocation3]  }
   0xc   :  { %746 = dma.done.wait [#allocation3], 16  }
   0xd   :  { %747 = vsyncadd [#allocation3], 4294967280 }
   0xe   :  { %23 = sfence }
   0xf   :  { %s667_s14 = sld [smem:[#allocation2 + $0x1]]  ;;  %s668_s15 = sld [smem:[#allocation2 + $0x3]]  ;;  %v777_v0 = vld [vmem:[%s1405_s0] sm:$0xf]  ;;  %v661_v1 = vld [vmem:[%s1405_s0 + $0x4] sm:$0xf]  ;;  %v24_v3 = vlaneseq }
  0x10   :  { %s669_s16 = sld [smem:[#allocation2 + $0x5]]  ;;  %s670_s17 = sld [smem:[#allocation2 + $0x7]]  ;;  %1412 = vst [vmem:[#allocation5_spill] sm:$0xff] %v777_v0  ;;  %v663_v2 = vld [vmem:[%s1405_s0 + $0x8] sm:$0xf] }
  0x11   :  { %s772_s18 = sld [smem:[#allocation2 + $0x9]]  ;;  %s59_s20 = sld [smem:[#allocation2]]  ;;  %v665_v4 = vld [vmem:[%s1405_s0 + $0xc] sm:$0xf]  ;;  %v749_v12 = vmov 1983009808  }
  0x12   :  { %s660_s21 = sld [smem:[#allocation2 + $0x2]]  ;;  %s662_s24 = sld [smem:[#allocation2 + $0x4]]  ;;  %v110_v13 = vunpack.c.l.s4 %v749_v12  ;;  %v113_v23 = vshrl.u32 %v24_v3, 7  ;;  %v829_v45 = vand.u32 127, %v24_v3 }
  0x13   :  { %s664_s25 = sld [smem:[#allocation2 + $0x6]]  ;;  %s666_s30 = sld [smem:[#allocation2 + $0x8]] }
  0x14   :  { %v111_v26 = vunpack.c.0.s8 %v110_v13  ;;  %s750_s3 = smov 16   ;;  %s751_s4 = smov 112   ;;  %vm51_vm2 = vcmp.lt.s32.totalorder %v829_v45, 16  ;;  %v855_v57 = vadd.s32 128, %v829_v45  ;;  %vm131_vm3 = vcmp.lt.s32.totalorder %v829_v45, 112 }
  0x15   :  { %v88_v5 = vstv %s667_s14  ;;  %v91_v6 = vstv %s668_s15  ;;  %s752_s5 = smov 1   ;;  %s753_s6 = smov 127   ;;  %vm140_vm7 = vcmp.lt.s32.totalorder %v829_v45, 1  ;;  %vm149_vm8 = vcmp.lt.s32.totalorder %v829_v45, 127 }
  0x16   :  { %v89_v7 = vmul.f32 %v88_v5, %v777_v0  ;;  %v92_v8 = vmul.f32 %v661_v1, %v91_v6  ;;  %v95_v9 = vstv %s669_s16  ;;  %v99_v10 = vstv %s670_s17  ;;  %s885_s7 = sld [smem:[#allocation2 + $0x10]]  ;;  %s887_s8 = sld [smem:[#allocation2 + $0x11]] }
  0x17   :  { %v96_v11 = vmul.f32 %v663_v2, %v95_v9  ;;  %v100_v15 = vmul.f32 %v665_v4, %v99_v10  ;;  %v61_v16 = vstv %s59_s20  ;;  %v103_v25 = vstv %s772_s18  ;;  %s889_s9 = sld [smem:[#allocation2 + $0xe]]  ;;  %s891_s10 = sld [smem:[#allocation2 + $0xf]] }
  0x18   :  { %v93_v14 = vadd.f32 %v92_v8, %v89_v7  ;;  %v66_v17 = vstv %s660_s21  ;;  %v62_v18 = vmul.f32 %v61_v16, %v777_v0  ;;  %v72_v20 = vstv %s662_s24  ;;  %s893_s11 = sld [smem:[#allocation2 + $0x26]]  ;;  %s895_s12 = sld [smem:[#allocation2 + $0x27]] }
  0x19   :  { %v67_v19 = vmul.f32 %v661_v1, %v66_v17  ;;  %v78_v21 = vstv %s664_s25  ;;  %v73_v24 = vmul.f32 %v663_v2, %v72_v20  ;;  %v82_v32 = vstv %s666_s30  ;;  %s897_s13 = sld [smem:[#allocation2 + $0x28]]  ;;  %s899_s14 = sld [smem:[#allocation2 + $0x29]] }
  0x1a   :  { %v97_v22 = vadd.f32 %v96_v11, %v93_v14  ;;  %v79_v28 = vmul.f32 %v665_v4, %v78_v21  ;;  %v791_v33 = vsub.s32 %v111_v26, %v113_v23  ;;  %vm54_vm4 = vcmp.ge.s32.totalorder %v855_v57, 240  ;;  %s901_s15 = sld [smem:[#allocation2 + $0x16]]  ;;  %s903_s16 = sld [smem:[#allocation2 + $0x17]] }
  0x1b   :  { %v68_v27 = vadd.f32 %v67_v19, %v62_v18  ;;  %s905_s17 = sld [smem:[#allocation2 + $0x18]]  ;;  %s907_s18 = sld [smem:[#allocation2 + $0x19]]  ;;  %v38_v3 = vand.u32 15, %v855_v57  ;;  %v31_v4 = vand.u32 15, %v829_v45 }
  0x1c   :  { %v101_v29 = vadd.f32 %v100_v15, %v97_v22  ;;  %1413 = vst [vmem:[#allocation6_spill] sm:$0xff] %v791_v33  ;;  %s909_s1 = sld [smem:[#allocation2 + $0xa]]  ;;  %s911_s19 = sld [smem:[#allocation2 + $0xb]]  ;;  %v278_v5 = vstv %s885_s7  ;;  %v414_v7 = vstv %s887_s8 }
  0x1d   :  { %v74_v30 = vadd.f32 %v73_v24, %v68_v27  ;;  %s913_s20 = sld [smem:[#allocation2 + $0xc]]  ;;  %s915_s21 = sld [smem:[#allocation2 + $0x1a]]  ;;  %v272_v8 = vstv %s889_s9  ;;  %v408_v9 = vstv %s891_s10  ;;  %vm939_vm5 = vcmp.eq.s32.totalorder %v38_v3, 0 }
  0x1e   :  { %v104_v31 = vadd.f32 %v103_v25, %v101_v29  ;;  %s917_s22 = sld [smem:[#allocation2 + $0xd]]  ;;  %s919_s23 = sld [smem:[#allocation2 + $0x1b]]  ;;  %v364_v10 = vstv %s893_s11  ;;  %v500_v12 = vstv %s895_s12  ;;  %vm953_vm6 = vcmp.eq.s32.totalorder %v31_v4, 0 }
  0x1f   :  { %v80_v34 = vadd.f32 %v79_v28, %v74_v30  ;;  %s922_s24 = sld [smem:[#allocation2 + $0x12]]  ;;  %s925_s25 = sld [smem:[#allocation2 + $0x13]]  ;;  %v370_v14 = vstv %s897_s13  ;;  %v1408_v15 = vstv %s899_s14  ;;  %vm1049_vm9 = vcmp.eq.s32.totalorder %v38_v3, 15 }
  0x20   :  { %vm105_vm0 = vcmp.gt.f32.partialorder %v104_v31, 0.0  ;;  %v106_v35 = vmul.f32 0.01, %v104_v31  ;;  %s928_s26 = sld [smem:[#allocation2 + $0x1c]]  ;;  %s945_s28 = sld [smem:[#allocation2 + $0x15]]  ;;  %v296_v16 = vstv %s901_s15  ;;  %v432_v17 = vstv %s903_s16 }
  0x21   :  { %v83_v36 = vadd.f32 %v82_v32, %v80_v34  ;;  %s934_s27 = sld [smem:[#allocation2 + $0x14]]  ;;  %s947_s29 = sld [smem:[#allocation2 + $0x1d]]  ;;  %vm1061_vm10 = vcmp.eq.s32.totalorder %v31_v4, 15 }
  0x22   :  { %v793_v37 = vsel %vm105_vm0, %v104_v31, %v106_v35  ;;  %v262_v21 = vstv %s909_s1  ;;  %s962_s30 = sld [smem:[#allocation2 + $0x1e]]  ;;  %v398_v23 = vstv %s911_s19  ;;  %s1164_s7 = sld [smem:[#allocation2 + $0x23]] }
  0x23   :  { %v797_v38 = vrot.slane %v793_v37, %v791_v33  ;;  %vm84_vm1 = vcmp.gt.f32.partialorder %v83_v36, 0.0  ;;  %v85_v39 = vmul.f32 0.01, %v83_v36  ;;  %v308_v22 = vstv %s915_s21  ;;  %s1166_s8 = sld [smem:[#allocation2 + $0x24]]  ;;  %s1180_s9 = sld [smem:[#allocation2 + $0x25]] }
  0x24   :  { %v266_v24 = vstv %s913_s20  ;;  %v402_v25 = vstv %s917_s22  ;;  %v444_v26 = vstv %s919_s23  ;;  %s1182_s10 = sld [smem:[#allocation2 + $0x2a]]  ;;  %s1270_s11 = sld [smem:[#allocation2 + $0x2b]] }
  0x25   :  { %197 = vrot.lane.b32.xlu1 %v797_v38, %s750_s3  ;;  %v800_v40 = vsel %vm84_vm1, %v83_v36, %v85_v39  ;;  %v804_v41 = vcombine.high %v797_v38, %v797_v38  ;;  %s1282_s12 = sld [smem:[#allocation2 + $0x2c]]  ;;  %s1284_s13 = sld [smem:[#allocation2 + $0x2d]] }
  0x26   :  { %v808_v42 = vrot.slane %v800_v40, %v791_v33  ;;  %v309_v39 = vmul.f32 %v308_v22, %v800_v40  ;;  %s1314_s15 = sld [smem:[#allocation2 + $0x2e]]  ;;  %s1316_s16 = sld [smem:[#allocation2 + $0x2f]] }
  0x27   :  { %s1334_s1 = sld [smem:[#allocation2 + $0x35]]  ;;  %s1343_s19 = sld [smem:[#allocation2 + $0x32]] }
  0x28   :  { %119 = vrot.lane.b32.xlu0 %v808_v42, %s750_s3  ;;  %v813_v43 = vcombine.high %v808_v42, %v808_v42  ;;  %s1345_s20 = sld [smem:[#allocation2 + $0x36]]  ;;  %s1353_s21 = sld [smem:[#allocation2 + $0x33]] }
  0x29   :  { %199 = vrot.lane.b32.xlu1 %v804_v41, %s750_s3  ;;  %s1355_s22 = sld [smem:[#allocation2 + $0x37]]  ;;  %s1367_s23 = sld [smem:[#allocation2 + $0x38]] }
  0x2c   :  { %121 = vrot.lane.b32.xlu0 %v813_v43, %s750_s3  ;;  %s968_s3 = sld [smem:[#allocation2 + $0x1f]] }
  0x2d   :  { %129 = vrot.lane.b32.xlu1 %v813_v43, %s751_s4 }
  0x30   :  { %127 = vrot.lane.b32.xlu0 %v808_v42, %s751_s4 }
  0x31   :  { %207 = vrot.lane.b32.xlu1 %v804_v41, %s751_s4 }
  0x34   :  { %205 = vrot.lane.b32.xlu0 %v797_v38, %s751_s4  ;;  %s1043_s4 = sld [smem:[#allocation2 + $0x20]] }
  0x35   :  { %156 = vrot.lane.b32.xlu1 %v813_v43, %s752_s5 }
  0x38   :  { %154 = vrot.lane.b32.xlu0 %v808_v42, %s752_s5 }
  0x39   :  { %231 = vrot.lane.b32.xlu1 %v804_v41, %s752_s5 }
  0x3c   :  { %229 = vrot.lane.b32.xlu0 %v797_v38, %s752_s5 }
  0x97   :  { %v198_v44 = vpop.permute.xlu1 %197 }
  0x9a   :  { %v120_v46 = vpop.permute.xlu0 %119 }
  0x9b   :  { %v200_v47 = vpop.permute.xlu1 %199 }
  0x9c   :  { %v202_v52 = vsel %vm51_vm2, %v200_v47, %v198_v44  ;;  %v841_v53 = vsel %vm51_vm2, %v198_v44, %v200_v47  ;;  %v324_v47 = vstv %s928_s26  ;;  %s1373_s26 = sld [smem:[#allocation2 + $0x3b]] }
  0x9d   :  { %v844_v54 = vsel %vm51_vm2, %v797_v38, %v202_v52  ;;  %v971_v27 = vmul.f32 %v278_v5, %v841_v53  ;;  %v974_v28 = vmul.f32 %v414_v7, %v841_v53 }
  0x9e   :  { %v122_v48 = vpop.permute.xlu0 %121  ;;  %v977_v30 = vmul.f32 %v278_v5, %v844_v54  ;;  %v984_v35 = vmul.f32 %v414_v7, %v844_v54  ;;  %v325_v5 = vmul.f32 %v324_v47, %v793_v37 }
  0x9f   :  { %v832_v49 = vsel %vm51_vm2, %v120_v46, %v122_v48  ;;  %v124_v50 = vsel %vm51_vm2, %v122_v48, %v120_v46  ;;  %v130_v55 = vpop.permute.xlu1 %129  ;;  %v445_v48 = vmul.f32 %v444_v26, %v800_v40  ;;  %v460_v40 = vstv %s947_s29 }
  0xa0   :  { %v835_v51 = vsel %vm51_vm2, %v808_v42, %v124_v50  ;;  %138 = vrot.lane.b32.xlu1 %v832_v49, %s752_s5  ;;  %v981_v32 = vmul.f32 %v272_v8, %v832_v49  ;;  %v989_v44 = vmul.f32 %v408_v9, %v832_v49  ;;  %v461_v47 = vmul.f32 %v460_v40, %v793_v37 }
  0xa1   :  { %136 = vrot.lane.b32.xlu0 %v835_v51, %s752_s5  ;;  %v992_v46 = vmul.f32 %v272_v8, %v835_v51  ;;  %v1033_v26 = vrot.slane %v445_v48, %v791_v33  ;;  %v1077_v4 = vrot.slane %v325_v5, %v791_v33  ;;  %v388_v48 = vstv %s1314_s15 }
  0xa2   :  { %v128_v56 = vpop.permute.xlu0 %127 }
  0xa3   :  { %v133_v58 = vsel %vm131_vm3, %v130_v55, %v128_v56  ;;  %v208_v59 = vpop.permute.xlu1 %207  ;;  %v866_v62 = vsel %vm131_vm3, %v128_v56, %v130_v55  ;;  %v1003_v55 = vmul.f32 %v408_v9, %v835_v51 }
  0xa4   :  { %215 = vrot.lane.b32.xlu1 %v841_v53, %s752_s5  ;;  %v863_v61 = vsel %vm54_vm4, %v813_v43, %v133_v58  ;;  %v997_v50 = vmul.f32 %v364_v10, %v866_v62  ;;  %v1000_v52 = vmul.f32 %v500_v12, %v866_v62 }
  0xa5   :  { %213 = vrot.lane.b32.xlu0 %v844_v54, %s752_s5  ;;  %v1017_v7 = vmul.f32 %v364_v10, %v863_v61  ;;  %v1020_v8 = vmul.f32 %v500_v12, %v863_v61 }
  0xa6   :  { %v206_v60 = vpop.permute.xlu0 %205 }
  0xa7   :  { %v210_v63 = vsel %vm131_vm3, %v208_v59, %v206_v60  ;;  %v875_v2 = vsel %vm131_vm3, %v206_v60, %v208_v59  ;;  %v157_v6 = vpop.permute.xlu1 %156  ;;  %v1103_v60 = vrot.slane %v461_v47, %v791_v33 }
  0xa8   :  { %147 = vrot.lane.b32.xlu1 %v832_v49, %s753_s6  ;;  %v871_v1 = vsel %vm54_vm4, %v804_v41, %v210_v63  ;;  %v1013_v63 = vrot.slane %v309_v39, %v791_v33  ;;  %v1023_v9 = vmul.f32 %v370_v14, %v875_v2 }
  0xa9   :  { %145 = vrot.lane.b32.xlu0 %v835_v51, %s753_s6  ;;  %v1066_v57 = vmul.f32 %v370_v14, %v871_v1 }
  0xaa   :  { %v155_v11 = vpop.permute.xlu0 %154 }
  0xab   :  { %v232_v29 = vpop.permute.xlu1 %231  ;;  %v158_v58 = vsel %vm140_vm7, %v155_v11, %v157_v6  ;;  %v159_v59 = vsel %vm140_vm7, %v157_v6, %v155_v11  ;;  %v1028_v6 = vmul.f32 %v1408_v15, %v875_v2 }
  0xac   :  { %223 = vrot.lane.b32.xlu1 %v841_v53, %s753_s6  ;;  %v160_v10 = vsel %vm953_vm6, %v808_v42, %v159_v59  ;;  %v161_v12 = vsel %vm939_vm5, %v813_v43, %v158_v58 }
  0xad   :  { %221 = vrot.lane.b32.xlu0 %v844_v54, %s753_s6  ;;  %v1081_v14 = vmul.f32 %v296_v16, %v160_v10  ;;  %v1095_v5 = vmul.f32 %v432_v17, %v161_v12 }
  0xae   :  { %v230_v34 = vpop.permute.xlu0 %229 }
  0xaf   :  { %v234_v58 = vsel %vm140_vm7, %v232_v29, %v230_v34 }
  0xb0   :  { %164 = vrot.lane.b32.xlu1 %v813_v43, %s753_s6 }
  0xb1   :  { %162 = vrot.lane.b32.xlu0 %v808_v42, %s753_s6 }
  0xb4   :  { %239 = vrot.lane.b32.xlu1 %v804_v41, %s753_s6 }
  0xb5   :  { %237 = vrot.lane.b32.xlu0 %v797_v38, %s753_s6 }
  0xb8   :  { %172 = vrot.lane.b32.xlu1 %v863_v61, %s752_s5 }
  0xb9   :  { %170 = vrot.lane.b32.xlu0 %v866_v62, %s752_s5 }
  0xbc   :  { %247 = vrot.lane.b32.xlu1 %v871_v1, %s752_s5 }
  0xbd   :  { %245 = vrot.lane.b32.xlu0 %v875_v2, %s752_s5  ;;  %s1045_s5 = sld [smem:[#allocation2 + $0x21]] }
  0xc0   :  { %180 = vrot.lane.b32.xlu1 %v863_v61, %s753_s6 }
  0xc1   :  { %178 = vrot.lane.b32.xlu0 %v866_v62, %s753_s6 }
  0xc4   :  { %255 = vrot.lane.b32.xlu1 %v871_v1, %s753_s6 }
  0xc5   :  { %253 = vrot.lane.b32.xlu0 %v875_v2, %s753_s6  ;;  %s1148_s6 = sld [smem:[#allocation2 + $0x22]] }
 0x112   :  { %v139_v11 = vpop.permute.xlu1 %138 }
 0x113   :  { %v137_v39 = vpop.permute.xlu0 %136 }
 0x114   :  { %v141_v59 = vsel %vm140_vm7, %v137_v39, %v139_v11  ;;  %v142_v37 = vsel %vm140_vm7, %v139_v11, %v137_v39  ;;  %v1085_v39 = vmul.f32 %v296_v16, %v161_v12  ;;  %v233_v11 = vsel %vm140_vm7, %v230_v34, %v232_v29 }
 0x115   :  { %v143_v3 = vsel %vm953_vm6, %v835_v51, %v142_v37  ;;  %v144_v15 = vsel %vm939_vm5, %v832_v49, %v141_v59  ;;  %v1089_v37 = vmul.f32 %v432_v17, %v160_v10  ;;  %v235_v16 = vsel %vm953_vm6, %v797_v38, %v234_v58 }
 0x116   :  { %v216_v22 = vpop.permute.xlu1 %215  ;;  %v263_v56 = vmul.f32 %v262_v21, %v143_v3  ;;  %v264_v59 = vmul.f32 %v262_v21, %v144_v15  ;;  %v399_v34 = vmul.f32 %v398_v23, %v143_v3  ;;  %v400_v12 = vmul.f32 %v398_v23, %v144_v15 }
 0x117   :  { %v214_v10 = vpop.permute.xlu0 %213  ;;  %v236_v15 = vsel %vm939_vm5, %v804_v41, %v233_v11 }
 0x118   :  { %v217_v17 = vsel %vm140_vm7, %v214_v10, %v216_v22  ;;  %v218_v29 = vsel %vm140_vm7, %v216_v22, %v214_v10  ;;  %v334_v10 = vcombine.high %v1077_v4, %v1077_v4 }
 0x119   :  { %v219_v47 = vsel %vm953_vm6, %v844_v54, %v218_v29  ;;  %v220_v21 = vsel %vm939_vm5, %v841_v53, %v217_v17  ;;  %v346_v29 = vstv %s1043_s4  ;;  %v482_v17 = vstv %s1045_s5 }
 0x11a   :  { %v267_v58 = vmul.f32 %v266_v24, %v219_v47  ;;  %v268_v36 = vmul.f32 %v266_v24, %v220_v21  ;;  %v403_v31 = vmul.f32 %v402_v25, %v219_v47  ;;  %v404_v22 = vmul.f32 %v402_v25, %v220_v21  ;;  %v148_v3 = vpop.permute.xlu1 %147 }
 0x11b   :  { %v146_v23 = vpop.permute.xlu0 %145  ;;  %v1422_v47 = vstv %s905_s17  ;;  %v470_v21 = vcombine.high %v1103_v60, %v1103_v60  ;;  %s1330_s17 = sld [smem:[#allocation2 + $0x34]] }
 0x11c   :  { %v269_v20 = vadd.f32 %v267_v58, %v263_v56  ;;  %v270_v19 = vadd.f32 %v268_v36, %v264_v59  ;;  %v405_v24 = vadd.f32 %v403_v31, %v399_v34  ;;  %v406_v0 = vadd.f32 %v404_v22, %v400_v12 }
 0x11d   :  { %v1140_v33 = vmul.f32 %v1422_v47, %v235_v16  ;;  %v150_v25 = vsel %vm149_vm8, %v146_v23, %v148_v3  ;;  %v151_v11 = vsel %vm149_vm8, %v148_v3, %v146_v23  ;;  %v1423_v12 = vmov %v1422_v47 }
 0x11e   :  { %v275_v36 = vadd.f32 %v992_v46, %v269_v20  ;;  %v276_v31 = vadd.f32 %v981_v32, %v270_v19  ;;  %v411_v56 = vadd.f32 %v1003_v55, %v405_v24  ;;  %v412_v59 = vadd.f32 %v989_v44, %v406_v0  ;;  %v224_v34 = vpop.permute.xlu1 %223 }
 0x11f   :  { %v304_v58 = vmul.f32 %v1423_v12, %v236_v15  ;;  %v1424_v22 = vstv %s907_s18  ;;  %v152_v23 = vsel %vm1061_vm10, %v835_v51, %v150_v25  ;;  %v153_v20 = vsel %vm1049_vm9, %v832_v49, %v151_v11  ;;  %v222_v19 = vpop.permute.xlu0 %221 }
 0x120   :  { %v439_v3 = vmul.f32 %v1424_v22, %v235_v16  ;;  %v281_v0 = vadd.f32 %v977_v30, %v275_v36  ;;  %v282_v32 = vadd.f32 %v971_v27, %v276_v31  ;;  %v1425_v44 = vstv %s922_s24  ;;  %s1369_s24 = sld [smem:[#allocation2 + $0x39]] }
 0x121   :  { %v285_v46 = vmul.f32 %v1425_v44, %v152_v23  ;;  %v1426_v55 = vmov %v1425_v44  ;;  %v417_v24 = vadd.f32 %v984_v35, %v411_v56  ;;  %v418_v51 = vadd.f32 %v974_v28, %v412_v59 }
 0x122   :  { %v286_v16 = vmul.f32 %v1426_v55, %v153_v20  ;;  %v1427_v47 = vstv %s925_s25  ;;  %v225_v35 = vsel %vm149_vm8, %v222_v19, %v224_v34  ;;  %v226_v28 = vsel %vm149_vm8, %v224_v34, %v222_v19  ;;  %v165_v36 = vpop.permute.xlu1 %164  ;;  %s1371_s25 = sld [smem:[#allocation2 + $0x3a]] }
 0x123   :  { %v421_v49 = vmul.f32 %v1427_v47, %v152_v23  ;;  %v1428_v25 = vmov %v1427_v47  ;;  %v287_v27 = vadd.f32 %v285_v46, %v281_v0  ;;  %v227_v59 = vsel %vm1061_vm10, %v844_v54, %v225_v35  ;;  %v163_v22 = vpop.permute.xlu0 %162 }
 0x124   :  { %v422_v11 = vmul.f32 %v1428_v25, %v153_v20  ;;  %v288_v30 = vadd.f32 %v286_v16, %v282_v32  ;;  %v228_v12 = vsel %vm1049_vm9, %v841_v53, %v226_v28  ;;  %v1429_v23 = vstv %s934_s27 }
 0x125   :  { %v423_v31 = vadd.f32 %v421_v49, %v417_v24  ;;  %v291_v20 = vmul.f32 %v1429_v23, %v227_v59  ;;  %v1430_v0 = vmov %v1429_v23  ;;  %v1431_v44 = vstv %s945_s28 }
 0x126   :  { %v424_v56 = vadd.f32 %v422_v11, %v418_v51  ;;  %v292_v32 = vmul.f32 %v1430_v0, %v228_v12  ;;  %v427_v34 = vmul.f32 %v1431_v44, %v227_v59  ;;  %v1432_v19 = vmov %v1431_v44  ;;  %v240_v11 = vpop.permute.xlu1 %239 }
 0x127   :  { %v428_v46 = vmul.f32 %v1432_v19, %v228_v12  ;;  %v1433_v55 = vstv %s907_s18  ;;  %v166_v54 = vsel %vm149_vm8, %v163_v22, %v165_v36  ;;  %v167_v24 = vsel %vm149_vm8, %v165_v36, %v163_v22  ;;  %v238_v28 = vpop.permute.xlu0 %237  ;;  %s1332_s18 = sld [smem:[#allocation2 + $0x31]] }
 0x128   :  { %v440_v16 = vmul.f32 %v1433_v55, %v236_v15  ;;  %v352_v53 = vstv %s1148_s6  ;;  %v293_v51 = vadd.f32 %v291_v20, %v287_v27  ;;  %v294_v47 = vadd.f32 %v292_v32, %v288_v30 }
 0x129   :  { %v429_v49 = vadd.f32 %v427_v34, %v423_v31  ;;  %v430_v25 = vadd.f32 %v428_v46, %v424_v56  ;;  %v168_v15 = vsel %vm1061_vm10, %v808_v42, %v166_v54  ;;  %v169_v35 = vsel %vm1049_vm9, %v813_v43, %v167_v24 }
 0x12a   :  { %v488_v36 = vstv %s1164_s7  ;;  %v358_v59 = vstv %s1166_s8  ;;  %v299_v27 = vadd.f32 %v1081_v14, %v293_v51  ;;  %v300_v30 = vadd.f32 %v1085_v39, %v294_v47  ;;  %v173_v19 = vpop.permute.xlu1 %172 }
 0x12b   :  { %v435_v31 = vadd.f32 %v1089_v37, %v429_v49  ;;  %v436_v56 = vadd.f32 %v1095_v5, %v430_v25  ;;  %v1434_v12 = vstv %s962_s30  ;;  %v494_v20 = vstv %s1180_s9  ;;  %v171_v54 = vpop.permute.xlu0 %170 }
 0x12c   :  { %v341_v22 = vmul.f32 %v1434_v12, %v168_v15  ;;  %v1435_v42 = vmov %v1434_v12  ;;  %v376_v0 = vstv %s1182_s10  ;;  %v305_v43 = vadd.f32 %v1140_v33, %v299_v27 }
 0x12d   :  { %v342_v23 = vmul.f32 %v1435_v42, %v169_v35  ;;  %v306_v32 = vadd.f32 %v304_v58, %v300_v30  ;;  %v441_v44 = vadd.f32 %v439_v3, %v435_v31  ;;  %v442_v34 = vadd.f32 %v440_v16, %v436_v56 }
 0x12e   :  { %v1436_v46 = vstv %s968_s3  ;;  %v241_v37 = vsel %vm149_vm8, %v238_v28, %v240_v11  ;;  %v242_v5 = vsel %vm149_vm8, %v240_v11, %v238_v28  ;;  %v321_v33 = vadd.f32 %v1013_v63, %v305_v43 }
 0x12f   :  { %v477_v14 = vmul.f32 %v1436_v46, %v168_v15  ;;  %v1437_v55 = vmov %v1436_v46  ;;  %v1438_v58 = vcombine.high %v1013_v63, %v1013_v63  ;;  %v457_v16 = vadd.f32 %v1033_v26, %v441_v44  ;;  %v246_v31 = vpop.permute.xlu0 %245 }
 0x130   :  { %v478_v39 = vmul.f32 %v1437_v55, %v169_v35  ;;  %v1439_v24 = vcombine.high %v1033_v26, %v1033_v26  ;;  %v243_v47 = vsel %vm1061_vm10, %v797_v38, %v241_v37  ;;  %v244_v49 = vsel %vm1049_vm9, %v804_v41, %v242_v5  ;;  %v248_v35 = vpop.permute.xlu1 %247 }
 0x131   :  { %v322_v3 = vadd.f32 %v1438_v58, %v306_v32  ;;  %v174_v25 = vsel %vm140_vm7, %v171_v54, %v173_v19  ;;  %v175_v63 = vsel %vm140_vm7, %v173_v19, %v171_v54  ;;  %v337_v11 = vadd.f32 %v1077_v4, %v321_v33 }
 0x132   :  { %v458_v51 = vadd.f32 %v1439_v24, %v442_v34  ;;  %v473_v15 = vadd.f32 %v1103_v60, %v457_v16  ;;  %v347_v41 = vmul.f32 %v346_v29, %v243_v47  ;;  %v348_v28 = vmul.f32 %v346_v29, %v244_v49 }
 0x133   :  { %v338_v26 = vadd.f32 %v334_v10, %v322_v3  ;;  %v483_v27 = vmul.f32 %v482_v17, %v243_v47  ;;  %v484_v30 = vmul.f32 %v482_v17, %v244_v49  ;;  %v343_v4 = vadd.f32 %v341_v22, %v337_v11 }
 0x134   :  { %v474_v38 = vadd.f32 %v470_v21, %v458_v51  ;;  %v479_v56 = vadd.f32 %v477_v14, %v473_v15  ;;  %v176_v60 = vsel %vm953_vm6, %v866_v62, %v175_v63  ;;  %v177_v29 = vsel %vm939_vm5, %v863_v61, %v174_v25  ;;  %v181_v32 = vpop.permute.xlu1 %180  ;;  %v179_v14 = vpop.permute.xlu0 %178 }
 0x135   :  { %v344_v10 = vadd.f32 %v342_v23, %v338_v26  ;;  %v249_v17 = vsel %vm140_vm7, %v246_v31, %v248_v35  ;;  %v250_v21 = vsel %vm140_vm7, %v248_v35, %v246_v31  ;;  %v349_v22 = vadd.f32 %v347_v41, %v343_v4 }
 0x136   :  { %v480_v12 = vadd.f32 %v478_v39, %v474_v38  ;;  %v485_v23 = vadd.f32 %v483_v27, %v479_v56  ;;  %v353_v44 = vmul.f32 %v352_v53, %v176_v60  ;;  %v354_v34 = vmul.f32 %v352_v53, %v177_v29 }
 0x137   :  { %v350_v42 = vadd.f32 %v348_v28, %v344_v10  ;;  %v489_v19 = vmul.f32 %v488_v36, %v176_v60  ;;  %v490_v46 = vmul.f32 %v488_v36, %v177_v29  ;;  %v251_v55 = vsel %vm953_vm6, %v875_v2, %v250_v21 }
 0x138   :  { %v486_v43 = vadd.f32 %v484_v30, %v480_v12  ;;  %v252_v39 = vsel %vm939_vm5, %v871_v1, %v249_v17  ;;  %v182_v37 = vsel %vm149_vm8, %v179_v14, %v181_v32  ;;  %v183_v5 = vsel %vm149_vm8, %v181_v32, %v179_v14  ;;  %v256_v26 = vpop.permute.xlu1 %255 }
 0x139   :  { %v355_v53 = vadd.f32 %v353_v44, %v349_v22  ;;  %v356_v54 = vadd.f32 %v354_v34, %v350_v42  ;;  %v491_v33 = vadd.f32 %v489_v19, %v485_v23  ;;  %v359_v58 = vmul.f32 %v358_v59, %v251_v55 }
 0x13a   :  { %v492_v36 = vadd.f32 %v490_v46, %v486_v43  ;;  %v360_v18 = vmul.f32 %v358_v59, %v252_v39  ;;  %v495_v3 = vmul.f32 %v494_v20, %v251_v55  ;;  %v496_v13 = vmul.f32 %v494_v20, %v252_v39  ;;  %v254_v20 = vpop.permute.xlu0 %253 }
 0x13b   :  { %v512_v16 = vstv %s1270_s11  ;;  %v184_v24 = vsel %vm1061_vm10, %v866_v62, %v182_v37  ;;  %v185_v51 = vsel %vm1049_vm9, %v863_v61, %v183_v5  ;;  %v1440_v47 = vstv %s899_s14  ;;  %s1328_s14 = sld [smem:[#allocation2 + $0x30]] }
 0x13c   :  { %v508_v49 = vmul.f32 %v1440_v47, %v871_v1  ;;  %v361_v25 = vadd.f32 %v359_v58, %v355_v53  ;;  %v362_v63 = vadd.f32 %v360_v18, %v356_v54  ;;  %v497_v59 = vadd.f32 %v495_v3, %v491_v33 }
 0x13d   :  { %v498_v11 = vadd.f32 %v496_v13, %v492_v36  ;;  %v377_v15 = vmul.f32 %v376_v0, %v184_v24  ;;  %v378_v62 = vmul.f32 %v376_v0, %v185_v51  ;;  %v382_v38 = vstv %s1282_s12 }
 0x13e   :  { %v518_v35 = vstv %s1284_s13  ;;  %v367_v61 = vadd.f32 %v997_v50, %v361_v25  ;;  %v368_v41 = vadd.f32 %v1017_v7, %v362_v63  ;;  %v503_v28 = vadd.f32 %v1000_v52, %v497_v59 }
 0x13f   :  { %v504_v27 = vadd.f32 %v1020_v8, %v498_v11  ;;  %v513_v30 = vmul.f32 %v512_v16, %v184_v24  ;;  %v514_v31 = vmul.f32 %v512_v16, %v185_v51  ;;  %v257_v0 = vsel %vm149_vm8, %v254_v20, %v256_v26 }
 0x140   :  { %v258_v50 = vsel %vm149_vm8, %v256_v26, %v254_v20  ;;  %v373_v52 = vadd.f32 %v1023_v9, %v367_v61  ;;  %v374_v7 = vadd.f32 %v1066_v57, %v368_v41  ;;  %v509_v8 = vadd.f32 %v1028_v6, %v503_v28 }
 0x141   :  { %v510_v4 = vadd.f32 %v508_v49, %v504_v27  ;;  %v259_v10 = vsel %vm1061_vm10, %v875_v2, %v257_v0  ;;  %v260_v45 = vsel %vm1049_vm9, %v871_v1, %v258_v50  ;;  %v524_v1 = vstv %s1316_s16 }
 0x142   :  { %v379_v9 = vadd.f32 %v377_v15, %v373_v52  ;;  %v380_v57 = vadd.f32 %v378_v62, %v374_v7  ;;  %v515_v6 = vadd.f32 %v513_v30, %v509_v8  ;;  %v383_v12 = vmul.f32 %v382_v38, %v259_v10  ;;  %v715_v52 = vld [vmem:[%s1405_s0 + $0x4] sm:$0xf]  ;;  %v1441_v7 = vld [vmem:[#allocation6_spill] sm:$0xff] }
 0x143   :  { %v516_v56 = vadd.f32 %v514_v31, %v510_v4  ;;  %v384_v60 = vmul.f32 %v382_v38, %v260_v45  ;;  %v519_v40 = vmul.f32 %v518_v35, %v259_v10  ;;  %v520_v2 = vmul.f32 %v518_v35, %v260_v45 }
 0x144   :  { %v385_v29 = vadd.f32 %v383_v12, %v379_v9  ;;  %v534_v42 = vstv %s1328_s14  ;;  %v538_v23 = vstv %s1330_s17  ;;  %v563_v19 = vstv %s1332_s18  ;;  %v720_v9 = vld [vmem:[%s1405_s0 + $0x8] sm:$0xf]  ;;  %v1442_v12 = vld [vmem:[#allocation5_spill] sm:$0xff] }
 0x145   :  { %v386_v17 = vadd.f32 %v384_v60, %v380_v57  ;;  %v521_v21 = vadd.f32 %v519_v40, %v515_v6  ;;  %v522_v22 = vadd.f32 %v520_v2, %v516_v56  ;;  %v567_v46 = vstv %s1334_s1 }
 0x146   :  { %v389_v43 = vadd.f32 %v388_v48, %v385_v29  ;;  %v594_v14 = vstv %s1343_s19  ;;  %v598_v55 = vstv %s1345_s20  ;;  %v625_v54 = vstv %s1353_s21  ;;  %v725_v29 = vld [vmem:[%s1405_s0 + $0xc] sm:$0xf] }
 0x147   :  { %v390_v32 = vadd.f32 %v388_v48, %v386_v17  ;;  %v525_v44 = vadd.f32 %v524_v1, %v521_v21  ;;  %v526_v34 = vadd.f32 %v524_v1, %v522_v22  ;;  %v629_v33 = vstv %s1355_s22 }
 0x148   :  { %vm391_vm11 = vcmp.gt.f32.partialorder %v389_v43, 0.0  ;;  %v393_v39 = vmul.f32 0.01, %v389_v43  ;;  %v556_v45 = vstv %s1367_s23  ;;  %v586_v56 = vstv %s1369_s24 }
 0x149   :  { %vm392_vm12 = vcmp.gt.f32.partialorder %v390_v32, 0.0  ;;  %v394_v37 = vmul.f32 0.01, %v390_v32  ;;  %vm527_vm13 = vcmp.gt.f32.partialorder %v525_v44, 0.0  ;;  %vm528_vm14 = vcmp.gt.f32.partialorder %v526_v34, 0.0 }
 0x14a   :  { %v529_v5 = vmul.f32 0.01, %v525_v44  ;;  %v530_v53 = vmul.f32 0.01, %v526_v34  ;;  %v395_v36 = vsel %vm391_vm11, %v389_v43, %v393_v39  ;;  %v617_v2 = vstv %s1371_s25 }
 0x14b   :  { %v396_v58 = vsel %vm392_vm12, %v390_v32, %v394_v37  ;;  %v535_v13 = vmul.f32 %v534_v42, %v395_v36  ;;  %v564_v47 = vmul.f32 %v563_v19, %v395_v36  ;;  %v595_v59 = vmul.f32 %v594_v14, %v395_v36 }
 0x14c   :  { %v531_v18 = vsel %vm527_vm13, %v525_v44, %v529_v5  ;;  %v532_v3 = vsel %vm528_vm14, %v526_v34, %v530_v53  ;;  %v536_v16 = vmul.f32 %v534_v42, %v396_v58  ;;  %v565_v49 = vmul.f32 %v563_v19, %v396_v58 }
 0x14d   :  { %v539_v24 = vmul.f32 %v538_v23, %v531_v18  ;;  %v540_v51 = vmul.f32 %v538_v23, %v532_v3  ;;  %v568_v25 = vmul.f32 %v567_v46, %v531_v18  ;;  %v569_v63 = vmul.f32 %v567_v46, %v532_v3 }
 0x14e   :  { %v596_v11 = vmul.f32 %v594_v14, %v396_v58  ;;  %v599_v15 = vmul.f32 %v598_v55, %v531_v18  ;;  %v600_v62 = vmul.f32 %v598_v55, %v532_v3  ;;  %v626_v61 = vmul.f32 %v625_v54, %v395_v36 }
 0x14f   :  { %v541_v26 = vadd.f32 %v539_v24, %v535_v13  ;;  %v542_v20 = vadd.f32 %v540_v51, %v536_v16  ;;  %v570_v38 = vadd.f32 %v568_v25, %v564_v47  ;;  %v571_v35 = vadd.f32 %v569_v63, %v565_v49 }
 0x150   :  { %v627_v41 = vmul.f32 %v625_v54, %v396_v58  ;;  %v601_v27 = vadd.f32 %v599_v15, %v595_v59  ;;  %v602_v30 = vadd.f32 %v600_v62, %v596_v11  ;;  %v630_v31 = vmul.f32 %v629_v33, %v531_v18 }
 0x151   :  { %v545_v28 = vcombine.low %v541_v26, %v542_v20  ;;  %v575_v0 = vcombine.low %v570_v38, %v571_v35  ;;  %v631_v50 = vmul.f32 %v629_v33, %v532_v3  ;;  %v648_v23 = vstv %s1373_s26 }
 0x152   :  { %v606_v4 = vcombine.low %v601_v27, %v602_v30  ;;  %v632_v10 = vadd.f32 %v630_v31, %v626_v61 }
 0x153   :  { %v552_v8 = vrot.slane %v545_v28, %v1441_v7  ;;  %v582_v57 = vrot.slane %v575_v0, %v1441_v7  ;;  %v633_v6 = vadd.f32 %v631_v50, %v627_v41 }
 0x154   :  { %v613_v40 = vrot.slane %v606_v4, %v1441_v7 }
 0x155   :  { %v554_v60 = vadd.f32 %v552_v8, %v1442_v12  ;;  %v584_v48 = vadd.f32 %v715_v52, %v582_v57  ;;  %v637_v1 = vcombine.low %v632_v10, %v633_v6 }
 0x156   :  { %v615_v21 = vadd.f32 %v720_v9, %v613_v40 }
 0x157   :  { %v557_v17 = vadd.f32 %v556_v45, %v554_v60  ;;  %v587_v22 = vadd.f32 %v586_v56, %v584_v48  ;;  %v644_v42 = vrot.slane %v637_v1, %v1441_v7 }
 0x158   :  { %v618_v32 = vadd.f32 %v617_v2, %v615_v21 }
 0x159   :  { %vm558_vm15 = vcmp.gt.f32.partialorder %v557_v17, 0.0  ;;  %v559_v43 = vmul.f32 0.01, %v557_v17  ;;  %vm588_vm0 = vcmp.gt.f32.partialorder %v587_v22, 0.0  ;;  %v589_v44 = vmul.f32 0.01, %v587_v22 }
 0x15a   :  { %v646_v34 = vadd.f32 %v725_v29, %v644_v42  ;;  %vm619_vm1 = vcmp.gt.f32.partialorder %v618_v32, 0.0  ;;  %v620_v46 = vmul.f32 0.01, %v618_v32 }
 0x15b   :  { %v560_v19 = vsel %vm558_vm15, %v557_v17, %v559_v43  ;;  %v590_v14 = vsel %vm588_vm0, %v587_v22, %v589_v44 }
 0x15c   :  { %561 = vst [vmem:[%s1407_s2] sm:$0xf] %v560_v19  ;;  %v649_v55 = vadd.f32 %v648_v23, %v646_v34  ;;  %717 = vst [vmem:[%s1407_s2 + $0x4] sm:$0xf] %v590_v14  ;;  %v621_v39 = vsel %vm619_vm1, %v618_v32, %v620_v46 }
 0x15d   :  { %722 = vst [vmem:[%s1407_s2 + $0x8] sm:$0xf] %v621_v39 }
 0x15e   :  { %vm650_vm2 = vcmp.gt.f32.partialorder %v649_v55, 0.0  ;;  %v651_v37 = vmul.f32 0.01, %v649_v55 }
 0x160   :  { %v652_v5 = vsel %vm650_vm2, %v649_v55, %v651_v37 }
 0x161   :  { %727 = vst [vmem:[%s1407_s2 + $0xc] sm:$0xf] %v652_v5 }
 0x162   :  { %659 = vsyncpa [#allocation3], 1 }

</bundles_post_ra>
